<compile_context>
chip_gen: v7x
topology: tpu7x:2x2x1
jax: 0.10.0
libtpu: 0.0.40
codegen_flags: <defaults>
</compile_context>

<pallas_src>
import jax
import jax.numpy as jnp
from jax.experimental import pallas as pl
from jax.experimental.pallas import tpu as pltpu

D = 32            # embedding dim (both towers)
H1, H2 = 32, 16   # MLP hidden sizes
NUM_USERS, NUM_ITEMS = 50, 100


def _gather_t(table_ref, idx_ref, tb):
    """One-hot-matmul row gather. table_ref: (D, n_rows), idx_ref: (1, TB).
    Returns (D, TB) with batch on lanes."""
    n_rows = table_ref.shape[1]
    onehot = jnp.where(
        jax.lax.broadcasted_iota(jnp.int32, (n_rows, tb), 0) == idx_ref[...],
        1.0, 0.0).astype(table_ref.dtype)                       # (n_rows, TB)
    return jnp.dot(table_ref[...], onehot,
                   preferred_element_type=jnp.float32)          # (D, TB)


def neumf_kernel(ug_idx_ref, ig_idx_ref, um_idx_ref, im_idx_ref,
                 tug_ref, tig_ref, tum_ref, tim_ref,
                 wg_ref,                       # (D, 1)  GMF out weight * w_cls[0]
                 w1u_ref, w1i_ref, b1_ref,     # (H1, D), (H1, D), (H1, 1)
                 w2_ref, b2_ref,               # (H2, H1), (H2, 1)
                 w3_ref,                       # (H2, 1)  MLP out weight * w_cls[1]
                 bf_ref,                       # (1, 1)  fused bias
                 out_ref):                     # (1, TB)
    tb = out_ref.shape[1]

    # ---- fused embedding gathers (batch stays on lanes) ----
    u_gmf = _gather_t(tug_ref, ug_idx_ref, tb)    # (D, TB)
    i_gmf = _gather_t(tig_ref, ig_idx_ref, tb)
    u_mlp = _gather_t(tum_ref, um_idx_ref, tb)
    i_mlp = _gather_t(tim_ref, im_idx_ref, tb)

    # ---- GMF tower: elementwise product + weighted sublane reduction (VPU+XLU) ----
    gmf = jnp.sum(wg_ref[...] * (u_gmf * i_gmf), axis=0, keepdims=True)   # (1, TB)

    # ---- MLP tower: concat([u, i]) @ W1 == W1u.T @ u.T + W1i.T @ i.T ----
    h = (jnp.dot(w1u_ref[...], u_mlp, preferred_element_type=jnp.float32)
         + jnp.dot(w1i_ref[...], i_mlp, preferred_element_type=jnp.float32)
         + b1_ref[...])                                                   # (H1, TB)
    h = jnp.maximum(h, 0.0)
    h = jnp.dot(w2_ref[...], h, preferred_element_type=jnp.float32) + b2_ref[...]
    h = jnp.maximum(h, 0.0)                                               # (H2, TB)
    mlp = jnp.sum(w3_ref[...] * h, axis=0, keepdims=True)                 # (1, TB)

    # ---- head (Linear(2,1) folded into the weights above) + sigmoid ----
    out_ref[...] = jax.nn.sigmoid(gmf + mlp + bf_ref[...])


def prepare_kernel_params(p):
    """One-time transform: transpose to feature-on-sublane layout and fold the
    2->1 head Linear into the tower output weights/bias."""
    wc0, wc1 = p["w_cls"][0], p["w_cls"][1]
    return {
        "tug": p["emb_user_gmf"].T,                   # (D, NUM_USERS)
        "tig": p["emb_item_gmf"].T,                   # (D, NUM_ITEMS)
        "tum": p["emb_user_mlp"].T,
        "tim": p["emb_item_mlp"].T,
        "wg":  p["w_gmf"] * wc0,                      # (D, 1)
        "w1u": p["w1"][:D].T,                         # (H1, D)
        "w1i": p["w1"][D:].T,                         # (H1, D)
        "b1":  p["b1"].reshape(H1, 1),
        "w2":  p["w2"].T,                             # (H2, H1)
        "b2":  p["b2"].reshape(H2, 1),
        "w3":  p["w3"] * wc1,                         # (H2, 1)
        "bf":  (p["b_gmf"] * wc0 + p["b3"] * wc1 + p["b_cls"]).reshape(1, 1),
    }


def neumf_forward(kp, x):
    """kp: kernel-layout params from prepare_kernel_params.
    x = (user_idx_gmf, item_idx_gmf, user_idx_mlp, item_idx_mlp), each (B,) int."""
    ug, ig, um, im = (jnp.asarray(v, jnp.int32).reshape(1, -1) for v in x)
    b = ug.shape[1]
    tb = 128 if b % 128 == 0 else b          # batch tile (lane axis)
    grid = (b // tb,)

    idx_spec = pl.BlockSpec((1, tb), lambda i: (0, i))

    def resident(arr):                       # weights: same block every grid step
        return pl.BlockSpec(arr.shape, lambda i: (0, 0))

    weights = (kp["tug"], kp["tig"], kp["tum"], kp["tim"],
               kp["wg"], kp["w1u"], kp["w1i"], kp["b1"],
               kp["w2"], kp["b2"], kp["w3"], kp["bf"])

    out = pl.pallas_call(
        neumf_kernel,
        out_shape=jax.ShapeDtypeStruct((1, b), jnp.float32),
        grid=grid,
        in_specs=[idx_spec] * 4 + [resident(w) for w in weights],
        out_specs=pl.BlockSpec((1, tb), lambda i: (0, i)),
        compiler_params=pltpu.CompilerParams(
            dimension_semantics=("parallel",)),
    )(ug, ig, um, im, *weights)
    return out.reshape(b, 1)                 # match torch: (B, 1) probabilities


def init_params(key):
    """Torch-layout parameters (pre head-folding), used by the reference."""
    ks = jax.random.split(key, 14)
    s = 0.1
    return {
        "emb_user_gmf": s * jax.random.normal(ks[0], (NUM_USERS, D), jnp.float32),
        "emb_item_gmf": s * jax.random.normal(ks[1], (NUM_ITEMS, D), jnp.float32),
        "emb_user_mlp": s * jax.random.normal(ks[2], (NUM_USERS, D), jnp.float32),
        "emb_item_mlp": s * jax.random.normal(ks[3], (NUM_ITEMS, D), jnp.float32),
        "w_gmf": s * jax.random.normal(ks[4], (D, 1), jnp.float32),
        "b_gmf": s * jax.random.normal(ks[5], (1, 1), jnp.float32),
        "w1":    s * jax.random.normal(ks[6], (2 * D, H1), jnp.float32),
        "b1":    s * jax.random.normal(ks[7], (1, H1), jnp.float32),
        "w2":    s * jax.random.normal(ks[8], (H1, H2), jnp.float32),
        "b2":    s * jax.random.normal(ks[9], (1, H2), jnp.float32),
        "w3":    s * jax.random.normal(ks[10], (H2, 1), jnp.float32),
        "b3":    s * jax.random.normal(ks[11], (1, 1), jnp.float32),
        "w_cls": jnp.array([0.4, 0.6], jnp.float32)
                 + s * jax.random.normal(ks[12], (2,), jnp.float32),
        "b_cls": s * jax.random.normal(ks[13], (1,), jnp.float32),
    }


def neumf_reference(p, x):
    """Plain-JAX reference with the original (unfolded, untransposed) params."""
    ug, ig, um, im = x
    u_gmf = p["emb_user_gmf"][ug]
    i_gmf = p["emb_item_gmf"][ig]
    u_mlp = p["emb_user_mlp"][um]
    i_mlp = p["emb_item_mlp"][im]
    gmf = (u_gmf * i_gmf) @ p["w_gmf"] + p["b_gmf"]                      # (B, 1)
    h = jnp.concatenate([u_mlp, i_mlp], axis=1) @ p["w1"] + p["b1"]
    h = jnp.maximum(h, 0.0)
    h = h @ p["w2"] + p["b2"]
    h = jnp.maximum(h, 0.0)
    mlp = h @ p["w3"] + p["b3"]                                          # (B, 1)
    cat = jnp.concatenate([gmf, mlp], axis=1)                            # (B, 2)
    return jax.nn.sigmoid(cat @ p["w_cls"].reshape(2, 1) + p["b_cls"])   # (B, 1)


if __name__ == "__main__":
    B = 256   # batch; tiled into 128-lane slabs, grid of 2 "parallel" steps
    key = jax.random.PRNGKey(0)
    pkey, k0, k1, k2, k3 = jax.random.split(key, 5)
    params = init_params(pkey)
    kparams = prepare_kernel_params(params)

    ug = jax.random.randint(k0, (B,), 0, NUM_USERS, dtype=jnp.int32)
    ig = jax.random.randint(k1, (B,), 0, NUM_ITEMS, dtype=jnp.int32)
    um = jax.random.randint(k2, (B,), 0, NUM_USERS, dtype=jnp.int32)
    im = jax.random.randint(k3, (B,), 0, NUM_ITEMS, dtype=jnp.int32)
    x = (ug, ig, um, im)

    out = jax.block_until_ready(neumf_forward(kparams, x))
    ref = jax.block_until_ready(neumf_reference(params, x))

    assert out.shape == (B, 1) and out.dtype == jnp.float32
    assert bool(jnp.all(jnp.isfinite(out)))
    assert bool(jnp.all((out > 0) & (out < 1)))
    assert bool(jnp.allclose(out, ref, atol=1e-5, rtol=1e-5)), \
        f"max abs diff {float(jnp.max(jnp.abs(out - ref)))}"
    print("KERNEL_OK")
</pallas_src>

<mosaic_0001>
module attributes {stable_mosaic.version = 11 : i64} {
  func.func @neumf_kernel(%arg0: i32, %arg1: memref<1x128xi32, #tpu.memory_space<vmem>>, %arg2: memref<1x128xi32, #tpu.memory_space<vmem>>, %arg3: memref<1x128xi32, #tpu.memory_space<vmem>>, %arg4: memref<1x128xi32, #tpu.memory_space<vmem>>, %arg5: memref<32x50xf32, #tpu.memory_space<vmem>>, %arg6: memref<32x100xf32, #tpu.memory_space<vmem>>, %arg7: memref<32x50xf32, #tpu.memory_space<vmem>>, %arg8: memref<32x100xf32, #tpu.memory_space<vmem>>, %arg9: memref<32x1xf32, #tpu.memory_space<vmem>>, %arg10: memref<32x32xf32, #tpu.memory_space<vmem>>, %arg11: memref<32x32xf32, #tpu.memory_space<vmem>>, %arg12: memref<32x1xf32, #tpu.memory_space<vmem>>, %arg13: memref<16x32xf32, #tpu.memory_space<vmem>>, %arg14: memref<16x1xf32, #tpu.memory_space<vmem>>, %arg15: memref<16x1xf32, #tpu.memory_space<vmem>>, %arg16: memref<1x1xf32, #tpu.memory_space<vmem>>, %arg17: memref<1x128xf32, #tpu.memory_space<vmem>>) attributes {dimension_semantics = [#tpu.dimension_semantics<parallel>], iteration_bounds = array<i64: 2>, scalar_prefetch = 0 : i64, scratch_operands = 0 : i64, tpu.core_type = #tpu.core_type<tc>, window_params = [{transform_indices = @transform_0, window_bounds = array<i64: 1, 128>}, {transform_indices = @transform_1, window_bounds = array<i64: 1, 128>}, {transform_indices = @transform_2, window_bounds = array<i64: 1, 128>}, {transform_indices = @transform_3, window_bounds = array<i64: 1, 128>}, {pipeline_mode = #tpu.pipeline_mode<synchronous>, transform_indices = @transform_4, window_bounds = array<i64: 32, 50>}, {pipeline_mode = #tpu.pipeline_mode<synchronous>, transform_indices = @transform_5, window_bounds = array<i64: 32, 100>}, {pipeline_mode = #tpu.pipeline_mode<synchronous>, transform_indices = @transform_6, window_bounds = array<i64: 32, 50>}, {pipeline_mode = #tpu.pipeline_mode<synchronous>, transform_indices = @transform_7, window_bounds = array<i64: 32, 100>}, {pipeline_mode = #tpu.pipeline_mode<synchronous>, transform_indices = @transform_8, window_bounds = array<i64: 32, 1>}, {pipeline_mode = #tpu.pipeline_mode<synchronous>, transform_indices = @transform_9, window_bounds = array<i64: 32, 32>}, {pipeline_mode = #tpu.pipeline_mode<synchronous>, transform_indices = @transform_10, window_bounds = array<i64: 32, 32>}, {pipeline_mode = #tpu.pipeline_mode<synchronous>, transform_indices = @transform_11, window_bounds = array<i64: 32, 1>}, {pipeline_mode = #tpu.pipeline_mode<synchronous>, transform_indices = @transform_12, window_bounds = array<i64: 16, 32>}, {pipeline_mode = #tpu.pipeline_mode<synchronous>, transform_indices = @transform_13, window_bounds = array<i64: 16, 1>}, {pipeline_mode = #tpu.pipeline_mode<synchronous>, transform_indices = @transform_14, window_bounds = array<i64: 16, 1>}, {pipeline_mode = #tpu.pipeline_mode<synchronous>, transform_indices = @transform_15, window_bounds = array<i64: 1, 1>}, {transform_indices = @transform_16, window_bounds = array<i64: 1, 128>}]} {
    %0 = tpu.iota {dimensions = array<i32: 0>} : vector<50x128xi32>
    %c0 = arith.constant 0 : index
    %c0_0 = arith.constant 0 : index
    %1 = vector.load %arg1[%c0, %c0_0] : memref<1x128xi32, #tpu.memory_space<vmem>>, vector<1x128xi32>
    %2 = vector.broadcast %1 : vector<1x128xi32> to vector<50x128xi32>
    %3 = arith.cmpi eq, %0, %2 : vector<50x128xi32>
    %cst = arith.constant 1.000000e+00 : f32
    %cst_1 = arith.constant 0.000000e+00 : f32
    %4 = vector.broadcast %cst : f32 to vector<50x128xf32>
    %5 = vector.broadcast %cst_1 : f32 to vector<50x128xf32>
    %6 = arith.select %3, %4, %5 : vector<50x128xi1>, vector<50x128xf32>
    %c0_2 = arith.constant 0 : index
    %c0_3 = arith.constant 0 : index
    %7 = vector.load %arg5[%c0_2, %c0_3] : memref<32x50xf32, #tpu.memory_space<vmem>>, vector<32x50xf32>
    %cst_4 = arith.constant dense<0.000000e+00> : vector<32x128xf32>
    %8 = tpu.matmul %7, %6, %cst_4 {dimension_numbers = #tpu.dot_dimension_numbers<[1], [0], [0], [1], [0, 0, 1, 1], [], []>} : vector<32x50xf32>, vector<50x128xf32>, vector<32x128xf32> -> vector<32x128xf32>
    %9 = tpu.iota {dimensions = array<i32: 0>} : vector<100x128xi32>
    %c0_5 = arith.constant 0 : index
    %c0_6 = arith.constant 0 : index
    %10 = vector.load %arg2[%c0_5, %c0_6] : memref<1x128xi32, #tpu.memory_space<vmem>>, vector<1x128xi32>
    %11 = vector.broadcast %10 : vector<1x128xi32> to vector<100x128xi32>
    %12 = arith.cmpi eq, %9, %11 : vector<100x128xi32>
    %cst_7 = arith.constant 1.000000e+00 : f32
    %cst_8 = arith.constant 0.000000e+00 : f32
    %13 = vector.broadcast %cst_7 : f32 to vector<100x128xf32>
    %14 = vector.broadcast %cst_8 : f32 to vector<100x128xf32>
    %15 = arith.select %12, %13, %14 : vector<100x128xi1>, vector<100x128xf32>
    %c0_9 = arith.constant 0 : index
    %c0_10 = arith.constant 0 : index
    %16 = vector.load %arg6[%c0_9, %c0_10] : memref<32x100xf32, #tpu.memory_space<vmem>>, vector<32x100xf32>
    %cst_11 = arith.constant dense<0.000000e+00> : vector<32x128xf32>
    %17 = tpu.matmul %16, %15, %cst_11 {dimension_numbers = #tpu.dot_dimension_numbers<[1], [0], [0], [1], [0, 0, 1, 1], [], []>} : vector<32x100xf32>, vector<100x128xf32>, vector<32x128xf32> -> vector<32x128xf32>
    %18 = tpu.iota {dimensions = array<i32: 0>} : vector<50x128xi32>
    %c0_12 = arith.constant 0 : index
    %c0_13 = arith.constant 0 : index
    %19 = vector.load %arg3[%c0_12, %c0_13] : memref<1x128xi32, #tpu.memory_space<vmem>>, vector<1x128xi32>
    %20 = vector.broadcast %19 : vector<1x128xi32> to vector<50x128xi32>
    %21 = arith.cmpi eq, %18, %20 : vector<50x128xi32>
    %cst_14 = arith.constant 1.000000e+00 : f32
    %cst_15 = arith.constant 0.000000e+00 : f32
    %22 = vector.broadcast %cst_14 : f32 to vector<50x128xf32>
    %23 = vector.broadcast %cst_15 : f32 to vector<50x128xf32>
    %24 = arith.select %21, %22, %23 : vector<50x128xi1>, vector<50x128xf32>
    %c0_16 = arith.constant 0 : index
    %c0_17 = arith.constant 0 : index
    %25 = vector.load %arg7[%c0_16, %c0_17] : memref<32x50xf32, #tpu.memory_space<vmem>>, vector<32x50xf32>
    %cst_18 = arith.constant dense<0.000000e+00> : vector<32x128xf32>
    %26 = tpu.matmul %25, %24, %cst_18 {dimension_numbers = #tpu.dot_dimension_numbers<[1], [0], [0], [1], [0, 0, 1, 1], [], []>} : vector<32x50xf32>, vector<50x128xf32>, vector<32x128xf32> -> vector<32x128xf32>
    %27 = tpu.iota {dimensions = array<i32: 0>} : vector<100x128xi32>
    %c0_19 = arith.constant 0 : index
    %c0_20 = arith.constant 0 : index
    %28 = vector.load %arg4[%c0_19, %c0_20] : memref<1x128xi32, #tpu.memory_space<vmem>>, vector<1x128xi32>
    %29 = vector.broadcast %28 : vector<1x128xi32> to vector<100x128xi32>
    %30 = arith.cmpi eq, %27, %29 : vector<100x128xi32>
    %cst_21 = arith.constant 1.000000e+00 : f32
    %cst_22 = arith.constant 0.000000e+00 : f32
    %31 = vector.broadcast %cst_21 : f32 to vector<100x128xf32>
    %32 = vector.broadcast %cst_22 : f32 to vector<100x128xf32>
    %33 = arith.select %30, %31, %32 : vector<100x128xi1>, vector<100x128xf32>
    %c0_23 = arith.constant 0 : index
    %c0_24 = arith.constant 0 : index
    %34 = vector.load %arg8[%c0_23, %c0_24] : memref<32x100xf32, #tpu.memory_space<vmem>>, vector<32x100xf32>
    %cst_25 = arith.constant dense<0.000000e+00> : vector<32x128xf32>
    %35 = tpu.matmul %34, %33, %cst_25 {dimension_numbers = #tpu.dot_dimension_numbers<[1], [0], [0], [1], [0, 0, 1, 1], [], []>} : vector<32x100xf32>, vector<100x128xf32>, vector<32x128xf32> -> vector<32x128xf32>
    %c0_26 = arith.constant 0 : index
    %c0_27 = arith.constant 0 : index
    %36 = vector.load %arg9[%c0_26, %c0_27] : memref<32x1xf32, #tpu.memory_space<vmem>>, vector<32x1xf32>
    %37 = arith.mulf %8, %17 : vector<32x128xf32>
    %38 = vector.broadcast %36 : vector<32x1xf32> to vector<32x128xf32>
    %39 = arith.mulf %38, %37 : vector<32x128xf32>
    %cst_28 = arith.constant dense<0.000000e+00> : vector<128xf32>
    %40 = vector.multi_reduction <add>, %39, %cst_28 [0] : vector<32x128xf32> to vector<128xf32>
    %41 = vector.shape_cast %40 : vector<128xf32> to vector<1x128xf32>
    %c0_29 = arith.constant 0 : index
    %c0_30 = arith.constant 0 : index
    %42 = vector.load %arg10[%c0_29, %c0_30] : memref<32x32xf32, #tpu.memory_space<vmem>>, vector<32x32xf32>
    %cst_31 = arith.constant dense<0.000000e+00> : vector<32x128xf32>
    %43 = tpu.matmul %42, %26, %cst_31 {dimension_numbers = #tpu.dot_dimension_numbers<[1], [0], [0], [1], [0, 0, 1, 1], [], []>} : vector<32x32xf32>, vector<32x128xf32>, vector<32x128xf32> -> vector<32x128xf32>
    %c0_32 = arith.constant 0 : index
    %c0_33 = arith.constant 0 : index
    %44 = vector.load %arg11[%c0_32, %c0_33] : memref<32x32xf32, #tpu.memory_space<vmem>>, vector<32x32xf32>
    %cst_34 = arith.constant dense<0.000000e+00> : vector<32x128xf32>
    %45 = tpu.matmul %44, %35, %cst_34 {dimension_numbers = #tpu.dot_dimension_numbers<[1], [0], [0], [1], [0, 0, 1, 1], [], []>} : vector<32x32xf32>, vector<32x128xf32>, vector<32x128xf32> -> vector<32x128xf32>
    %46 = arith.addf %43, %45 : vector<32x128xf32>
    %c0_35 = arith.constant 0 : index
    %c0_36 = arith.constant 0 : index
    %47 = vector.load %arg12[%c0_35, %c0_36] : memref<32x1xf32, #tpu.memory_space<vmem>>, vector<32x1xf32>
    %48 = vector.broadcast %47 : vector<32x1xf32> to vector<32x128xf32>
    %49 = arith.addf %46, %48 : vector<32x128xf32>
    %cst_37 = arith.constant 0.000000e+00 : f32
    %50 = vector.broadcast %cst_37 : f32 to vector<32x128xf32>
    %51 = arith.maximumf %49, %50 : vector<32x128xf32>
    %c0_38 = arith.constant 0 : index
    %c0_39 = arith.constant 0 : index
    %52 = vector.load %arg13[%c0_38, %c0_39] : memref<16x32xf32, #tpu.memory_space<vmem>>, vector<16x32xf32>
    %cst_40 = arith.constant dense<0.000000e+00> : vector<16x128xf32>
    %53 = tpu.matmul %52, %51, %cst_40 {dimension_numbers = #tpu.dot_dimension_numbers<[1], [0], [0], [1], [0, 0, 1, 1], [], []>} : vector<16x32xf32>, vector<32x128xf32>, vector<16x128xf32> -> vector<16x128xf32>
    %c0_41 = arith.constant 0 : index
    %c0_42 = arith.constant 0 : index
    %54 = vector.load %arg14[%c0_41, %c0_42] : memref<16x1xf32, #tpu.memory_space<vmem>>, vector<16x1xf32>
    %55 = vector.broadcast %54 : vector<16x1xf32> to vector<16x128xf32>
    %56 = arith.addf %53, %55 : vector<16x128xf32>
    %cst_43 = arith.constant 0.000000e+00 : f32
    %57 = vector.broadcast %cst_43 : f32 to vector<16x128xf32>
    %58 = arith.maximumf %56, %57 : vector<16x128xf32>
    %c0_44 = arith.constant 0 : index
    %c0_45 = arith.constant 0 : index
    %59 = vector.load %arg15[%c0_44, %c0_45] : memref<16x1xf32, #tpu.memory_space<vmem>>, vector<16x1xf32>
    %60 = vector.broadcast %59 : vector<16x1xf32> to vector<16x128xf32>
    %61 = arith.mulf %60, %58 : vector<16x128xf32>
    %cst_46 = arith.constant dense<0.000000e+00> : vector<128xf32>
    %62 = vector.multi_reduction <add>, %61, %cst_46 [0] : vector<16x128xf32> to vector<128xf32>
    %63 = vector.shape_cast %62 : vector<128xf32> to vector<1x128xf32>
    %64 = arith.addf %41, %63 : vector<1x128xf32>
    %c0_47 = arith.constant 0 : index
    %c0_48 = arith.constant 0 : index
    %65 = vector.load %arg16[%c0_47, %c0_48] : memref<1x1xf32, #tpu.memory_space<vmem>>, vector<1x1xf32>
    %66 = vector.broadcast %65 : vector<1x1xf32> to vector<1x128xf32>
    %67 = arith.addf %64, %66 : vector<1x128xf32>
    %68 = arith.negf %67 : vector<1x128xf32>
    %69 = math.exp %68 : vector<1x128xf32>
    %cst_49 = arith.constant 1.000000e+00 : f32
    %70 = vector.broadcast %cst_49 : f32 to vector<1x128xf32>
    %71 = arith.addf %70, %69 : vector<1x128xf32>
    %72 = arith.divf %70, %71 : vector<1x128xf32>
    %c0_50 = arith.constant 0 : index
    %c0_51 = arith.constant 0 : index
    %73 = vector.load %arg17[%c0_50, %c0_51] : memref<1x128xf32, #tpu.memory_space<vmem>>, vector<1x128xf32>
    tpu.vector_store %arg17[%c0_50, %c0_51], %72 {strides = array<i32>} : memref<1x128xf32, #tpu.memory_space<vmem>>, vector<1x128xf32>,
    return
  }
  func.func @transform_0(%arg0: i32) -> (i32, i32) {
    %c0_i32 = arith.constant 0 : i32
    %c0_i32_0 = arith.constant 0 : i32
    return %c0_i32, %arg0 : i32, i32
  }
  func.func @transform_1(%arg0: i32) -> (i32, i32) {
    %c0_i32 = arith.constant 0 : i32
    %c0_i32_0 = arith.constant 0 : i32
    return %c0_i32, %arg0 : i32, i32
  }
  func.func @transform_2(%arg0: i32) -> (i32, i32) {
    %c0_i32 = arith.constant 0 : i32
    %c0_i32_0 = arith.constant 0 : i32
    return %c0_i32, %arg0 : i32, i32
  }
  func.func @transform_3(%arg0: i32) -> (i32, i32) {
    %c0_i32 = arith.constant 0 : i32
    %c0_i32_0 = arith.constant 0 : i32
    return %c0_i32, %arg0 : i32, i32
  }
  func.func @transform_4(%arg0: i32) -> (i32, i32) {
    %c0_i32 = arith.constant 0 : i32
    %c0_i32_0 = arith.constant 0 : i32
    %c0_i32_1 = arith.constant 0 : i32
    return %c0_i32, %c0_i32_0 : i32, i32
  }
  func.func @transform_5(%arg0: i32) -> (i32, i32) {
    %c0_i32 = arith.constant 0 : i32
    %c0_i32_0 = arith.constant 0 : i32
    %c0_i32_1 = arith.constant 0 : i32
    return %c0_i32, %c0_i32_0 : i32, i32
  }
  func.func @transform_6(%arg0: i32) -> (i32, i32) {
    %c0_i32 = arith.constant 0 : i32
    %c0_i32_0 = arith.constant 0 : i32
    %c0_i32_1 = arith.constant 0 : i32
    return %c0_i32, %c0_i32_0 : i32, i32
  }
  func.func @transform_7(%arg0: i32) -> (i32, i32) {
    %c0_i32 = arith.constant 0 : i32
    %c0_i32_0 = arith.constant 0 : i32
    %c0_i32_1 = arith.constant 0 : i32
    return %c0_i32, %c0_i32_0 : i32, i32
  }
  func.func @transform_8(%arg0: i32) -> (i32, i32) {
    %c0_i32 = arith.constant 0 : i32
    %c0_i32_0 = arith.constant 0 : i32
    %c0_i32_1 = arith.constant 0 : i32
    return %c0_i32, %c0_i32_0 : i32, i32
  }
  func.func @transform_9(%arg0: i32) -> (i32, i32) {
    %c0_i32 = arith.constant 0 : i32
    %c0_i32_0 = arith.constant 0 : i32
    %c0_i32_1 = arith.constant 0 : i32
    return %c0_i32, %c0_i32_0 : i32, i32
  }
  func.func @transform_10(%arg0: i32) -> (i32, i32) {
    %c0_i32 = arith.constant 0 : i32
    %c0_i32_0 = arith.constant 0 : i32
    %c0_i32_1 = arith.constant 0 : i32
    return %c0_i32, %c0_i32_0 : i32, i32
  }
  func.func @transform_11(%arg0: i32) -> (i32, i32) {
    %c0_i32 = arith.constant 0 : i32
    %c0_i32_0 = arith.constant 0 : i32
    %c0_i32_1 = arith.constant 0 : i32
    return %c0_i32, %c0_i32_0 : i32, i32
  }
  func.func @transform_12(%arg0: i32) -> (i32, i32) {
    %c0_i32 = arith.constant 0 : i32
    %c0_i32_0 = arith.constant 0 : i32
    %c0_i32_1 = arith.constant 0 : i32
    return %c0_i32, %c0_i32_0 : i32, i32
  }
  func.func @transform_13(%arg0: i32) -> (i32, i32) {
    %c0_i32 = arith.constant 0 : i32
    %c0_i32_0 = arith.constant 0 : i32
    %c0_i32_1 = arith.constant 0 : i32
    return %c0_i32, %c0_i32_0 : i32, i32
  }
  func.func @transform_14(%arg0: i32) -> (i32, i32) {
    %c0_i32 = arith.constant 0 : i32
    %c0_i32_0 = arith.constant 0 : i32
    %c0_i32_1 = arith.constant 0 : i32
    return %c0_i32, %c0_i32_0 : i32, i32
  }
  func.func @transform_15(%arg0: i32) -> (i32, i32) {
    %c0_i32 = arith.constant 0 : i32
    %c0_i32_0 = arith.constant 0 : i32
    %c0_i32_1 = arith.constant 0 : i32
    return %c0_i32, %c0_i32_0 : i32, i32
  }
  func.func @transform_16(%arg0: i32) -> (i32, i32) {
    %c0_i32 = arith.constant 0 : i32
    %c0_i32_0 = arith.constant 0 : i32
    return %c0_i32, %arg0 : i32, i32
  }
}

</mosaic_0001>

<bundles_post_ra>
// kernel: tpu_custom_call.1
= control target key start
LH: loop header
LB: loop body
LE: loop exit
PB: predicated region body
PF: predicated region fallthrough
CT: control target
= control target key end

     0   :  { %s3363_s0 = inlined_call_operand.hbm [shape: s32[1,256], index: 0, kind: input, shape index: {}]   ;;  %s3364_s1 = inlined_call_operand.hbm [shape: s32[1,256], index: 1, kind: input, shape index: {}]   ;;  %s3365_s2 = inlined_call_operand.hbm [shape: s32[1,256], index: 2, kind: input, shape index: {}]   ;;  %s3366_s3 = inlined_call_operand.hbm [shape: s32[1,256], index: 3, kind: input, shape index: {}]   ;;  %s3367_s4 = inlined_call_operand.vmem [shape: f32[32,50], index: 4, kind: input, shape index: {}]   ;;  %s3368_s5 = inlined_call_operand.vmem [shape: f32[32,100], index: 5, kind: input, shape index: {}]   ;;  %s3369_s6 = inlined_call_operand.vmem [shape: f32[32,50], index: 6, kind: input, shape index: {}]   ;;  %s3370_s7 = inlined_call_operand.vmem [shape: f32[32,100], index: 7, kind: input, shape index: {}]   ;;  %s3371_s8 = inlined_call_operand.vmem [shape: f32[32,1], index: 8, kind: input, shape index: {}]   ;;  %s3372_s9 = inlined_call_operand.hbm [shape: f32[32,32], index: 9, kind: input, shape index: {}]   ;;  %s3373_s10 = inlined_call_operand.hbm [shape: f32[32,32], index: 10, kind: input, shape index: {}]   ;;  %s3374_s11 = inlined_call_operand.vmem [shape: f32[32,1], index: 11, kind: input, shape index: {}]   ;;  %s3375_s12 = inlined_call_operand.vmem [shape: f32[16,32], index: 12, kind: input, shape index: {}]   ;;  %s3376_s13 = inlined_call_operand.vmem [shape: f32[16,1], index: 13, kind: input, shape index: {}]   ;;  %s3377_s14 = inlined_call_operand.vmem [shape: f32[16,1], index: 14, kind: input, shape index: {}]   ;;  %s3378_s15 = inlined_call_operand.<no memory space> [shape: f32[1,1], index: 15, kind: input, shape index: {}]   ;;  %s3379_s16 = inlined_call_operand.hbm [shape: f32[1,256], index: 16, kind: output, shape index: {}]  }
   0x1   :  { %3408 = sst [smem:[#allocation27_spill]] %s3363_s0  ;;  %v21_v0 = vstv %s3378_s15 }
   0x2   :  { %3409 = sst [smem:[#allocation28_spill]] %s3364_s1  ;;  %22 = vst [vmem:[#allocation2] sm:$0x1] %v21_v0 }
   0x3   :  { %3410 = sst [smem:[#allocation29_spill]] %s3369_s6 }
   0x4   :  { %3411 = sst [smem:[#allocation30_spill]] %s3370_s7 }
   0x5   :  { %3412 = sst [smem:[#allocation31_spill]] %s3372_s9 }
   0x6   :  { %3413 = sst [smem:[#allocation32_spill]] %s3375_s12 }
   0x7   :  { %3414 = sst [smem:[#allocation33_spill]] %s3376_s13 }
   0x8   :  { %3415 = sst [smem:[#allocation34_spill]] %s3377_s14 }
   0x9   :  { %3416 = sst [smem:[#allocation35_spill]] %s3379_s16 }
   0xa   :  { %23 = vsyncpa [#allocation4], 0 }
   0xb   :  { %25 = vsyncpa [#allocation4 + $0x1], 0 }
   0xc   :  { %26 = vsyncpa [#allocation7], 0 }
   0xd   :  { %28 = vsyncpa [#allocation7 + $0x1], 0 }
   0xe   :  { %29 = vsyncpa [#allocation10], 0 }
   0xf   :  { %31 = vsyncpa [#allocation10 + $0x1], 0 }
  0x10   :  { %32 = vsyncpa [#allocation13], 0 }
  0x11   :  { %33 = vsyncpa [#allocation5], 0 }
  0x12   :  { %35 = vsyncpa [#allocation5 + $0x1], 0  ;;  %s2622_s23 = smov 0   ;;  %s2624_s24 = smov 0  }
  0x13   :  { %s2626_s25 = smov 0   ;;  %s2628_s26 = smov 0  }
  0x14 LB: > { %3417 = sst [smem:[#allocation21_spill]] %s2508_s23  ;;  %s2643_s15 = sadd.s32 4294967295, %s2520_s26   ;;  %s2520_s26 = sphi %s2628_s26, %s3486_s26   ;;  %s2516_s25 = sphi %s2626_s25, %s3488_s25   ;;  %s2512_s24 = sphi %s2624_s24, %s3490_s24   ;;  %s2508_s23 = sphi %s2622_s23, %s3489_s23  }
  0x15   : > { %3418 = sst [smem:[#allocation22_spill]] %s2516_s25  ;;  %s1762_s27 = sadd.s32 4294967294, %s2520_s26  }
  0x16   : > { %p61_p0 = scmp.ne.s32.totalorder %s2512_s24, %s2508_s23  ;;  %p3385_p1 = scmp.eq.s32.totalorder %s2643_s15, 0 }
  0x17   : > { %p421_p3 = scmp.eq.s32.totalorder %s1762_s27, 1  ;;  %p1763_p5 = scmp.ge.s32.totalorder %s2520_s26, 1 }
  0x18   : > { %p2652_p4 = por %p3385_p1, %p61_p0  ;;  %p428_p7 = scmp.lt.s32.totalorder %s2520_s26, 3 }
  0x19   : > { %p2657_p6 = por %p421_p3, %p61_p0  ;;  %s2522_s0 = smov [#allocation11]  }
  0x1a   : > { %s3419_s28 = scalar_select %p2652_p4, 1, 0 }
  0x1b   : > { %s3420_s29 = scalar_select %p2657_p6, 1, 0 }
  0x1c   : > { %p2662_p8 = pnand %p1763_p5, %p428_p7  ;;  %s455_s17 = sshll.u32 %s2522_s0, 4  ;;  %s2666_s17 = int_to_ptr.vmem [resolvable:$true] %s455_s17 }
  0x1d   : > { %3421 = sst [smem:[#allocation23_spill]] %s3420_s29  ;;  %s2678_s19 = sadd.s32 1, %s2520_s26  }
  0x1e   : > { %s3422_s30 = scalar_select %p2662_p8, 1, 0 }
  0x1f   : > { %p2187_p9 = pneg %p2662_p8  ;;  %3424 = sst [smem:[#allocation24_spill]] %s2678_s19 }
  0x20   : > { %s48_s20 = sadd.s32 1, %s2516_s25  ;;  %s45_s21 = ssub.s32 %s2520_s26, %s2678_s19 }
  0x21   : > { %p2673_p11 = pnand %p2187_p9, %p3385_p1  ;;  %s3425_s9 = sld [smem:[#allocation31_spill]] }
  0x23   : > { %s3423_s18 = scalar_select %p2673_p11, 1, 0 }
  0x24   : > { %p3394_p13 = pneg %p2673_p11 }
  0x27   : > { %s2262_s0 = scalar_lea.hbm %s3425_s9, 512 }
  0x28   : > { %p2263_p12 = scmp.ne.s32.totalorder %s3425_s9, %s2262_s0  ;;  %p2269_p5 = scmp.lt.u32.totalorder %s2262_s0, %s3425_s9 }
  0x2a   : > { %p2265_p0 = pnand %p3394_p13, %p2263_p12 }
  0x2c   : > { %p2266_p3 = pneg %p2265_p0 }
  0x2e   : > { %p2271_p7 = pnand %p2269_p5, %p2266_p3 }
  0x30   : > { %2274 = shalt.err (!%p2271_p7)
}
  0x31   : > { %s2275_s22 = scalar_lea.vmem %s2666_s17, 512  ;;  %p2283_p2 = scmp.lt.s32.totalorder %s2666_s17, %s2666_s17 }
  0x32   : > { %p2276_p9 = scmp.ne.s32.totalorder %s2666_s17, %s2275_s22  ;;  %p2284_p12 = scmp.lt.s32.totalorder %s2275_s22, %s2275_s22 }
  0x34   : > { %p2278_p10 = pnand %p2276_p9, %p3394_p13  ;;  %p2285_p0 = por %p2284_p12, %p2283_p2 }
  0x36   : > { %p2279_p1 = pneg %p2278_p10 }
  0x38   : > { %p2286_p6 = pnand %p2285_p0, %p2279_p1 }
  0x3a   : > { %2289 = shalt.err (!%p2286_p6)
}
  0x3b   : > { %s3388_s12 = smov 128   ;;  %s3389_s16 = smov 8  }
  0x3c   : > { %2190 = dma.hbm_to_vmem [thread:$0]  (!%p2673_p11), %s3425_s9, 512, %s2666_s17, [#allocation10], %s3388_s12, %s3388_s12, %s3389_s16  }
  0x3d   : > { %p46_p1 = scmp.eq.s32.totalorder %s45_s21, 0  ;;  %p55_p2 = scmp.ne.s32.totalorder %s2516_s25, %s2512_s24 }
  0x3e   : > { %p56_p6 = scmp.eq.s32.totalorder %s2520_s26, 0  ;;  %p2213_p10 = scmp.lt.s32.totalorder %s2520_s26, 2 }
  0x3f   : > { %s2718_s27 = scalar_select %p46_p1, %s2516_s25, %s48_s20  }
  0x40   : > { %p57_p3 = por %p56_p6, %p55_p2  ;;  %p3427_p5 = scmp.eq.s32.totalorder %s2643_s15, 1 }
  0x41   : > { %3426 = sst [smem:[#allocation25_spill]] %s2718_s27  ;;  %s2727_s22 = sand.u32 1, %s2516_s25  }
  0x42   : > { %p2722_p7 = por %p3427_p5, %p55_p2  ;;  %s2730_s19 = sshll.u32 %s2520_s26, 4 }
  0x43   : > { %p2732_p9 = pnand %p2213_p10, %p57_p3  ;;  %s3396_s21 = sand.u32 1, %s2520_s26  }
  0x44   : > { %s3428_s0 = scalar_select %p2722_p7, 1, 0 }
  0x45   : > { %s3430_s17 = scalar_select %p2732_p9, 1, 0 }
  0x46   : > { %3429 = sst [smem:[#allocation26_spill]] %s3428_s0  ;;  %s3431_s1 = sld [smem:[#allocation28_spill]] }
  0x47   : > { %s517_s12 = scalar_lea.vmem [#allocation6], %s2727_s22  ;;  %s2748_s9 = scalar_lea.sflag [#allocation7], %s3396_s21 }
  0x48   : > { %s524_s16 = sshll.u32 %s517_s12, 4  ;;  %p2754_p0 = pneg %p2732_p9  ;;  %s2744_s16 = int_to_ptr.vmem [resolvable:$true] %s524_s16 }
  0x4a   : > { %s3432_s25 = scalar_select %p2754_p0, 1, 0 }
  0x4c   : > { %s2741_s29 = scalar_lea.hbm %s3431_s1, %s2730_s19  ;;  %s2295_s12 = scalar_lea.hbm %s3431_s1, 32 }
  0x4d   : > { %s2290_s27 = scalar_lea.hbm %s2741_s29, 16  ;;  %p2296_p6 = scmp.lt.u32.totalorder %s2741_s29, %s3431_s1 }
  0x4e   : > { %p2291_p12 = scmp.ne.s32.totalorder %s2741_s29, %s2290_s27  ;;  %p2297_p10 = scmp.lt.u32.totalorder %s2295_s12, %s2290_s27 }
  0x4f   : > { %p2299_p5 = scmp.lt.u32.totalorder %s2290_s27, %s2741_s29 }
  0x50   : > { %p2293_p1 = pnand %p2754_p0, %p2291_p12  ;;  %p2298_p3 = por %p2297_p10, %p2296_p6 }
  0x52   : > { %p2294_p2 = pneg %p2293_p1  ;;  %p2300_p13 = por %p2299_p5, %p2298_p3 }
  0x54   : > { %p2301_p7 = pnand %p2300_p13, %p2294_p2 }
  0x56   : > { %2304 = shalt.err (!%p2301_p7)
}
  0x57   : > { %s2305_s21 = scalar_lea.vmem %s2744_s16, 16  ;;  %s2525_s20 = smov [#allocation6]  }
  0x58   : > { %p2306_p12 = scmp.ne.s32.totalorder %s2744_s16, %s2305_s21  ;;  %s2310_s23 = sshll.u32 %s2525_s20, 4  ;;  %s2311_s23 = int_to_ptr.vmem [resolvable:$false] %s2310_s23 }
  0x59   : > { %s2312_s14 = scalar_lea.vmem %s2311_s23, 32  ;;  %p2313_p8 = scmp.lt.s32.totalorder %s2744_s16, %s2311_s23 }
  0x5a   : > { %p2308_p1 = pnand %p2306_p12, %p2754_p0  ;;  %p2314_p11 = scmp.lt.s32.totalorder %s2312_s14, %s2305_s21 }
  0x5c   : > { %p2309_p4 = pneg %p2308_p1  ;;  %p2315_p6 = por %p2314_p11, %p2313_p8 }
  0x5e   : > { %p2316_p10 = pnand %p2315_p6, %p2309_p4 }
  0x60   : > { %2319 = shalt.err (!%p2316_p10)
}
  0x61   : > { %2200 = dma.hbm_to_vmem [thread:$0]  (!%p2732_p9), %s2741_s29, 16, %s2744_s16, %s2748_s9  }
  0x62   : > { %s2526_s27 = smov [#allocation12]   ;;  %s2320_s20 = scalar_lea.hbm %s3373_s10, 512 }
  0x63   : > { %s468_s0 = sshll.u32 %s2526_s27, 4  ;;  %p2321_p8 = scmp.ne.s32.totalorder %s3373_s10, %s2320_s20  ;;  %s469_s0 = int_to_ptr.vmem [resolvable:$true] %s468_s0 }
  0x64   : > { %p3433_p4 = scmp.ne.s32.totalorder %s3423_s18, 0  ;;  %p2327_p2 = scmp.lt.u32.totalorder %s2320_s20, %s3373_s10 }
  0x66   : > { %p3434_p11 = pneg %p3433_p4 }
  0x68   : > { %p2323_p13 = pnand %p2321_p8, %p3434_p11 }
  0x6a   : > { %p2324_p7 = pneg %p2323_p13 }
  0x6c   : > { %p2329_p3 = pnand %p2327_p2, %p2324_p7 }
  0x6e   : > { %2332 = shalt.err (!%p2329_p3)
}
  0x6f   : > { %s2333_s16 = scalar_lea.vmem %s469_s0, 512  ;;  %p3435_p12 = pmov %p3434_p11 }
  0x70   : > { %p2334_p5 = scmp.ne.s32.totalorder %s469_s0, %s2333_s16  ;;  %p2341_p10 = scmp.lt.s32.totalorder %s469_s0, %s469_s0 }
  0x71   : > { %p2342_p9 = scmp.lt.s32.totalorder %s2333_s16, %s2333_s16 }
  0x72   : > { %p2336_p1 = pnand %p2334_p5, %p3435_p12 }
  0x73   : > { %p2343_p0 = por %p2342_p9, %p2341_p10 }
  0x74   : > { %p2337_p6 = pneg %p2336_p1 }
  0x76   : > { %p2344_p8 = pnand %p2343_p0, %p2337_p6 }
  0x78   : > { %2347 = shalt.err (!%p2344_p8)
}
  0x79   : > { %s3436_s1 = smov 8   ;;  %s3437_s7 = smov 128  }
  0x7a   : > { %2193 = dma.hbm_to_vmem [thread:$0]  (!%p3433_p4), %s3373_s10, 512, %s469_s0, [#allocation13], %s3437_s7, %s3437_s7, %s3436_s1  }
  0x7b   : > { %s3438_s23 = sld [smem:[#allocation27_spill]]  ;;  %s500_s18 = scalar_lea.vmem [#allocation3], %s2727_s22 }
  0x7c   : > { %s507_s16 = sshll.u32 %s500_s18, 4  ;;  %s498_s6 = scalar_lea.sflag [#allocation4], %s2727_s22  ;;  %s508_s16 = int_to_ptr.vmem [resolvable:$true] %s507_s16 }
  0x7d   : > { %p3440_p0 = scmp.ne.s32.totalorder %s3432_s25, 0 }
  0x81   : > { %s3439_s21 = smov %s3438_s23  ;;  %s2805_s14 = scalar_lea.hbm %s3438_s23, %s2730_s19 }
  0x82   : > { %s2348_s13 = scalar_lea.hbm %s2805_s14, 16  ;;  %s2353_s1 = scalar_lea.hbm %s3439_s21, 32 }
  0x83   : > { %p2349_p9 = scmp.ne.s32.totalorder %s2805_s14, %s2348_s13  ;;  %p2354_p4 = scmp.lt.u32.totalorder %s2805_s14, %s3439_s21 }
  0x84   : > { %p2355_p7 = scmp.lt.u32.totalorder %s2353_s1, %s2348_s13  ;;  %p2357_p3 = scmp.lt.u32.totalorder %s2348_s13, %s2805_s14 }
  0x85   : > { %p2351_p11 = pnand %p2349_p9, %p3440_p0 }
  0x86   : > { %p2356_p2 = por %p2355_p7, %p2354_p4 }
  0x87   : > { %p2352_p13 = pneg %p2351_p11 }
  0x88   : > { %p2358_p5 = por %p2357_p3, %p2356_p2 }
  0x8a   : > { %p2359_p12 = pnand %p2358_p5, %p2352_p13 }
  0x8c   : > { %2362 = shalt.err (!%p2359_p12)
}
  0x8d   : > { %s2363_s12 = scalar_lea.vmem %s508_s16, 16  ;;  %s2527_s20 = smov [#allocation3]  }
  0x8e   : > { %p2364_p1 = scmp.ne.s32.totalorder %s508_s16, %s2363_s12  ;;  %s2368_s23 = sshll.u32 %s2527_s20, 4  ;;  %s2369_s23 = int_to_ptr.vmem [resolvable:$false] %s2368_s23 }
  0x8f   : > { %s2370_s18 = scalar_lea.vmem %s2369_s23, 32  ;;  %p2371_p8 = scmp.lt.s32.totalorder %s508_s16, %s2369_s23 }
  0x90   : > { %p2366_p6 = pnand %p2364_p1, %p3440_p0  ;;  %p2372_p9 = scmp.lt.s32.totalorder %s2370_s18, %s2363_s12 }
  0x92   : > { %p2367_p10 = pneg %p2366_p6  ;;  %p2373_p11 = por %p2372_p9, %p2371_p8 }
  0x94   : > { %p2374_p4 = pnand %p2373_p11, %p2367_p10 }
  0x96   : > { %2377 = shalt.err (!%p2374_p4)
}
  0x97   : > { %p3441_p7 = scmp.ne.s32.totalorder %s3430_s17, 0  ;;  %s2830_s0 = scalar_lea.hbm %s3365_s2, %s2730_s19 }
  0x98   : > { %s534_s1 = scalar_lea.vmem [#allocation8], %s2727_s22  ;;  %s2378_s27 = scalar_lea.hbm %s2830_s0, 16 }
  0x99   : > { %2197 = dma.hbm_to_vmem [thread:$0]  (!%p3441_p7), %s2805_s14, 16, %s508_s16, %s498_s6  }
  0x9a   : > { %s541_s7 = sshll.u32 %s534_s1, 4  ;;  %p2379_p13 = scmp.ne.s32.totalorder %s2830_s0, %s2378_s27  ;;  %s542_s7 = int_to_ptr.vmem [resolvable:$true] %s541_s7 }
  0x9b   : > { %s2383_s6 = scalar_lea.hbm %s3365_s2, 32  ;;  %p2384_p5 = scmp.lt.u32.totalorder %s2830_s0, %s3365_s2 }
  0x9c   : > { %p2381_p2 = pnand %p2379_p13, %p3440_p0  ;;  %p2385_p12 = scmp.lt.u32.totalorder %s2383_s6, %s2378_s27 }
  0x9d   : > { %p2387_p6 = scmp.lt.u32.totalorder %s2378_s27, %s2830_s0 }
  0x9e   : > { %p2382_p3 = pneg %p2381_p2  ;;  %p2386_p1 = por %p2385_p12, %p2384_p5 }
  0xa0   : > { %p2388_p10 = por %p2387_p6, %p2386_p1 }
  0xa2   : > { %p2389_p8 = pnand %p2388_p10, %p2382_p3 }
  0xa4   : > { %2392 = shalt.err (!%p2389_p8)
}
  0xa5   : > { %s2393_s23 = scalar_lea.vmem %s542_s7, 16  ;;  %s2528_s18 = smov [#allocation8]  }
  0xa6   : > { %p2394_p9 = scmp.ne.s32.totalorder %s542_s7, %s2393_s23  ;;  %s2398_s13 = sshll.u32 %s2528_s18, 4  ;;  %s2399_s13 = int_to_ptr.vmem [resolvable:$false] %s2398_s13 }
  0xa7   : > { %s2400_s29 = scalar_lea.vmem %s2399_s13, 32  ;;  %p2401_p13 = scmp.lt.s32.totalorder %s542_s7, %s2399_s13 }
  0xa8   : > { %p2396_p11 = pnand %p2394_p9, %p3440_p0  ;;  %p2402_p2 = scmp.lt.s32.totalorder %s2400_s29, %s2393_s23 }
  0xaa   : > { %p2397_p4 = pneg %p2396_p11  ;;  %p2403_p7 = por %p2402_p2, %p2401_p13 }
  0xac   : > { %p2404_p5 = pnand %p2403_p7, %p2397_p4 }
  0xae   : > { %2407 = shalt.err (!%p2404_p5)
}
  0xaf   : > { %p3442_p12 = scmp.ne.s32.totalorder %s3430_s17, 0  ;;  %s2855_s12 = scalar_lea.hbm %s3366_s3, %s2730_s19 }
  0xb0   : > { %s551_s20 = scalar_lea.vmem [#allocation9], %s2727_s22  ;;  %s3443_s14 = sand.u32 1, %s2520_s26  }
  0xb1   : > { %2203 = dma.hbm_to_vmem [thread:$0]  (!%p3442_p12), %s2830_s0, 16, %s542_s7, %s2748_s9  }
  0xb2   : > { %s558_s6 = sshll.u32 %s551_s20, 4  ;;  %s549_s16 = scalar_lea.sflag [#allocation10], %s3443_s14  ;;  %s559_s6 = int_to_ptr.vmem [resolvable:$true] %s558_s6 }
  0xb3   : > { %s2408_s23 = scalar_lea.hbm %s2855_s12, 16  ;;  %s2413_s7 = scalar_lea.hbm %s3366_s3, 32 }
  0xb4   : > { %p2409_p7 = scmp.ne.s32.totalorder %s2855_s12, %s2408_s23  ;;  %p2414_p6 = scmp.lt.u32.totalorder %s2855_s12, %s3366_s3 }
  0xb5   : > { %p2415_p10 = scmp.lt.u32.totalorder %s2413_s7, %s2408_s23  ;;  %p2417_p9 = scmp.lt.u32.totalorder %s2408_s23, %s2855_s12 }
  0xb6   : > { %p2411_p3 = pnand %p2409_p7, %p3440_p0 }
  0xb7   : > { %p2416_p8 = por %p2415_p10, %p2414_p6 }
  0xb8   : > { %p2412_p1 = pneg %p2411_p3 }
  0xb9   : > { %p2418_p11 = por %p2417_p9, %p2416_p8 }
  0xbb   : > { %p2419_p4 = pnand %p2418_p11, %p2412_p1 }
  0xbd   : > { %2422 = shalt.err (!%p2419_p4)
}
  0xbe   : > { %s2423_s22 = scalar_lea.vmem %s559_s6, 16  ;;  %s2529_s13 = smov [#allocation9]  }
  0xbf   : > { %p2424_p13 = scmp.ne.s32.totalorder %s559_s6, %s2423_s22  ;;  %s2428_s29 = sshll.u32 %s2529_s13, 4  ;;  %s2429_s29 = int_to_ptr.vmem [resolvable:$false] %s2428_s29 }
  0xc0   : > { %s2430_s1 = scalar_lea.vmem %s2429_s29, 32  ;;  %p2431_p7 = scmp.lt.s32.totalorder %s559_s6, %s2429_s29 }
  0xc1   : > { %p2426_p2 = pnand %p2424_p13, %p3440_p0  ;;  %p2432_p3 = scmp.lt.s32.totalorder %s2430_s1, %s2423_s22 }
  0xc3   : > { %p2427_p5 = pneg %p2426_p2  ;;  %p2433_p12 = por %p2432_p3, %p2431_p7 }
  0xc5   : > { %p2434_p6 = pnand %p2433_p12, %p2427_p5 }
  0xc7   : > { %2437 = shalt.err (!%p2434_p6)
}
  0xc8   : > { %p3444_p10 = scmp.ne.s32.totalorder %s3430_s17, 0  ;;  %p3445_p1 = scmp.ne.s32.totalorder %s3422_s30, 0 }
  0xc9   : > { %s2880_s25 = sand.u32 (!%p3445_p1), 1, %s2512_s24   ;;  %p3446_p0 = scmp.ne.s32.totalorder (!%p3445_p1), %s3419_s28, 0 }
  0xca   : > { %2206 = dma.hbm_to_vmem [thread:$0]  (!%p3444_p10), %s2855_s12, 16, %s559_s6, %s549_s16  }
  0xcb   : > { %567 = sbr.rel (%p3445_p1) target bundleno = 1019 (0x3fb), region = 84  ;;  %s570_s27 = scalar_lea.sflag (!%p3445_p1), [#allocation4], %s2880_s25 }
  0xcc   : > { %s572_s20 = scalar_lea.vmem (!%p3445_p1), [#allocation3], %s2880_s25 }
  0xd2   : > { %2483 = dma.done.wait (%p3446_p0), %s570_s27, 16  }
  0xd3   : > { %2485 = vsyncadd (%p3446_p0), %s570_s27, 4294967280  ;;  %s577_s17 = sand.u32 1, %s2643_s15   ;;  %s580_s30 = scalar_lea.vmem [#allocation6], %s2880_s25 }
  0xd4   : > { %s578_s12 = scalar_lea.sflag [#allocation7], %s577_s17 }
  0xd5   : > { %2487 = dma.done.wait (%p3446_p0), %s578_s12, 32  }
  0xd6   : > { %2489 = vsyncadd (%p3446_p0), %s578_s12, 4294967264  ;;  %s588_s6 = scalar_lea.vmem [#allocation8], %s2880_s25  ;;  %s594_s14 = scalar_lea.sflag [#allocation10], %s577_s17 }
  0xd7   : > { %s596_s16 = scalar_lea.vmem [#allocation9], %s2880_s25 }
  0xd8   : > { %2491 = dma.done.wait (%p3446_p0), %s594_s14, 16  }
  0xd9   : > { %2493 = vsyncadd (%p3446_p0), %s594_s14, 4294967280  ;;  %p3447_p12 = scmp.eq.s32.totalorder %s2643_s15, 0 }
  0xdb   : > { %2495 = dma.done.wait (%p3447_p12), [#allocation10], 512   ;;  %p3448_p8 = pmov %p3447_p12 }
  0xdd   : > { %2497 = vsyncadd (%p3448_p8), [#allocation10], 4294966784  ;;  %p3449_p9 = pmov %p3448_p8 }
  0xde   : > { %p3450_p11 = pmov %p3448_p8 }
  0xdf   : > { %2499 = dma.done.wait (%p3449_p9), [#allocation13], 512  }
  0xe0   : > { %2501 = vsyncadd (%p3450_p11), [#allocation13], 4294966784  ;;  %v663_v1 = vlaneseq  ;;  %v2530_v3 = vmov 0   ;;  %vm694_vm0 = vcmask 408576   ;;  %vm837_vm1 = vcmask 818176   ;;  %v690_v11 = vld [vmem:[%s3367_s4] sm:$0xff] }
  0xe1   : > { %2256 = vset.pattern.permute.xlu0 %v2530_v3  ;;  %2257 = vset.pattern.permute.xlu1 %v2530_v3  ;;  %v2925_v9 = vld [vmem:[%s580_s30] ss:$0 sm:$0xff]  ;;  %v2531_v13 = vmov 1.0|1.0   ;;  %v1443_v22 = vld [vmem:[%s3374_s11 + $0x10] sm:$0xff]  ;;  %v1442_v26 = vld [vmem:[%s3374_s11 + $0x8] sm:$0xff] }
  0xe2   : > { %v2908_v2 = vshrl.u32 %v663_v1, 7  ;;  %v1774_v10 = vld [vmem:[%s572_s20] ss:$0 sm:$0xff]  ;;  %1940 = vmatprep.mubr.msk.f32.mxu0 %vm694_vm0, %v690_v11  ;;  %1457 = vperm.xlu1 %2257, %v1443_v22   ;;  %v1444_v27 = vld [vmem:[%s3374_s11 + $0x18] sm:$0xff]  ;;  %v2532_v28 = vmov 0.0   ;;  %v1198_v34 = vld [vmem:[%s3371_s8 + $0x8] sm:$0xff] }
  0xe3   : > { %v833_v12 = vld [vmem:[%s3368_s5] sm:$0xff]  ;;  %v691_v35 = vld [vmem:[%s3367_s4 + $0x8] sm:$0xff]  ;;  %v692_v37 = vld [vmem:[%s3367_s4 + $0x10] sm:$0xff]  ;;  %s3465_s7 = sld [smem:[#allocation33_spill]]  ;;  %s3468_s1 = sld [smem:[#allocation29_spill]] }
  0xe4   : > { %v2911_v4 = vadd.s32 8, %v2908_v2  ;;  %v2914_v5 = vadd.s32 16, %v2908_v2  ;;  %v2917_v6 = vadd.s32 24, %v2908_v2  ;;  %v2920_v7 = vadd.s32 32, %v2908_v2  ;;  %1972 = vmatprep.mubr.msk.f32.mxu1 %vm837_vm1, %v833_v12  ;;  %v1441_v21 = vld [vmem:[%s3374_s11] sm:$0xff]  ;;  %v693_v42 = vld [vmem:[%s3367_s4 + $0x18] sm:$0xff] }
  0xe5   : > { %v2923_v8 = vadd.s32 40, %v2908_v2  ;;  %vm807_vm2 = vcmp.eq.s32.totalorder %v2908_v2, %v2925_v9  ;;  %vm676_vm7 = vcmp.eq.s32.totalorder %v2908_v2, %v1774_v10  ;;  %v2957_v15 = vadd.s32 48, %v2908_v2  ;;  %1447 = vperm.xlu0 %2256, %v1441_v21   ;;  %v3037_v30 = vld [vmem:[%s588_s6] ss:$0 sm:$0xff]  ;;  %v1199_v46 = vld [vmem:[%s3371_s8 + $0x10] sm:$0xff]  ;;  %v1200_v47 = vld [vmem:[%s3371_s8 + $0x18] sm:$0xff] }
  0xe6   : > { %vm808_vm3 = vcmp.eq.s32.totalorder %v2911_v4, %v2925_v9  ;;  %vm809_vm4 = vcmp.eq.s32.totalorder %v2914_v5, %v2925_v9  ;;  %vm810_vm5 = vcmp.eq.s32.totalorder %v2917_v6, %v2925_v9  ;;  %vm677_vm8 = vcmp.eq.s32.totalorder %v2911_v4, %v1774_v10  ;;  %1462 = vperm.xlu1 %2257, %v1444_v27   ;;  %v1197_v33 = vld [vmem:[%s3371_s8] sm:$0xff]  ;;  %v834_v49 = vld [vmem:[%s3368_s5 + $0x8] sm:$0xff]  ;;  %v835_v50 = vld [vmem:[%s3368_s5 + $0x10] sm:$0xff]  ;;  %s3473_s18 = sld [smem:[#allocation30_spill]]  ;;  %s3476_s0 = sld [smem:[#allocation34_spill]] }
  0xe7   : > { %vm2081_vm6 = vmpackc.low %vm808_vm3, %vm807_vm2  ;;  %vm811_vm10 = vcmp.eq.s32.totalorder %v2920_v7, %v2925_v9  ;;  %vm812_vm11 = vcmp.eq.s32.totalorder %v2923_v8, %v2925_v9  ;;  %v2960_v16 = vadd.s32 56, %v2908_v2  ;;  %vm678_vm12 = vcmp.eq.s32.totalorder %v2914_v5, %v1774_v10  ;;  %v3103_v40 = vld [vmem:[%s596_s16] ss:$0 sm:$0xff]  ;;  %v836_v53 = vld [vmem:[%s3368_s5 + $0x18] sm:$0xff]  ;;  %s3477_s29 = sld [smem:[#allocation32_spill]]  ;;  %s3478_s17 = sld [smem:[#allocation26_spill]] }
  0xe8   : > { %2082 = vmatprep.subr.msk.bf16.mxu1 %vm2081_vm6, %v2531_v13  ;;  %vm2948_vm9 = vmpackc.low %vm810_vm5, %vm809_vm4  ;;  %vm679_vm13 = vcmp.eq.s32.totalorder %v2917_v6, %v1774_v10  ;;  %vm680_vm2 = vcmp.eq.s32.totalorder %v2920_v7, %v1774_v10  ;;  %vm681_vm3 = vcmp.eq.s32.totalorder %v2923_v8, %v1774_v10  ;;  %vm813_vm4 = vcmp.eq.s32.totalorder %v2957_v15, %v2925_v9  ;;  %v1242_v63 = vld [vmem:[#allocation12] sm:$0xff]  ;;  %v1592_v3 = vld [vmem:[#allocation2] sm:$0x1]  ;;  %s1845_s12 = sshll.u32 %s2643_s15, 4  ;;  %s662_s30 = scalar_lea.vmem [#allocation14], %s2880_s25 }
  0xe9   : > { %2084 = vmatpush3.bf16.msk.msra.mxu1 %vm2081_vm6, %v2531_v13  ;;  %vm2069_vm14 = vmpackc.low %vm677_vm8, %vm676_vm7  ;;  %vm814_vm5 = vcmp.eq.s32.totalorder %v2960_v16, %v2925_v9  ;;  %v2981_v18 = vadd.s32 64, %v2908_v2  ;;  %v2984_v19 = vadd.s32 72, %v2908_v2  ;;  %v3014_v24 = vadd.s32 80, %v2908_v2  ;;  %1452 = vperm.xlu0 %2256, %v1442_v26   ;;  %v1475_v39 = vld [vmem:[%s3465_s7] sm:$0xff]  ;;  %v1476_v41 = vld [vmem:[%s3465_s7 + $0x8] sm:$0xff]  ;;  %s1623_s6 = sshll.u32 %s662_s30, 4  ;;  %s3321_s6 = int_to_ptr.vmem [resolvable:$true] %s1623_s6 }
  0xea   : > { %2086 = vmatprep.subr.msk.bf16.mxu1 %vm2948_vm9, %v2531_v13  ;;  %vm2968_vm15 = vmpackc.low %vm812_vm11, %vm811_vm10  ;;  %2070 = vmatprep.subr.msk.bf16.mxu0 %vm2069_vm14, %v2531_v13  ;;  %v3017_v25 = vadd.s32 88, %v2908_v2  ;;  %v3054_v32 = vadd.s32 96, %v2908_v2  ;;  %v958_v45 = vld [vmem:[%s3468_s1] sm:$0xff]  ;;  %v959_v56 = vld [vmem:[%s3468_s1 + $0x8] sm:$0xff]  ;;  %s3479_s23 = sld [smem:[#allocation35_spill]]  ;;  %s1611_s22 = scalar_lea.sflag [#allocation5], %s2880_s25 }
  0xeb   : > { %2072 = vmatpush3.bf16.msk.msra.mxu0 %vm2069_vm14, %v2531_v13  ;;  %vm2073_vm6 = vmpackc.low %vm679_vm13, %vm678_vm12  ;;  %vm815_vm10 = vcmp.eq.s32.totalorder %v2981_v18, %v2925_v9  ;;  %vm816_vm11 = vcmp.eq.s32.totalorder %v2984_v19, %v2925_v9  ;;  %vm707_vm12 = vcmask 1041408   ;;  %vm817_vm14 = vcmp.eq.s32.totalorder %v3014_v24, %v2925_v9  ;;  %1212 = vperm.xlu1 %2257, %v1198_v34   ;;  %v960_v57 = vld [vmem:[%s3468_s1 + $0x10] sm:$0xff]  ;;  %v961_v58 = vld [vmem:[%s3468_s1 + $0x18] sm:$0xff]  ;;  %s2438_s13 = scalar_lea.vmem %s3321_s6, 16  ;;  %s2533_s15 = smov [#allocation14]  }
  0xec   : > { %2074 = vmatprep.subr.msk.bf16.mxu0 %vm2073_vm6, %v2531_v13  ;;  %vm2993_vm7 = vmpackc.low %vm681_vm3, %vm680_vm2  ;;  %vm944_vm2 = vcmp.eq.s32.totalorder %v2908_v2, %v3037_v30  ;;  %vm945_vm3 = vcmp.eq.s32.totalorder %v2911_v4, %v3037_v30  ;;  %v1093_v54 = vld [vmem:[%s3473_s18] sm:$0xff]  ;;  %v1094_v60 = vld [vmem:[%s3473_s18 + $0x8] sm:$0xff]  ;;  %p2439_p4 = scmp.ne.s32.totalorder %s3321_s6, %s2438_s13  ;;  %s2442_s16 = sshll.u32 %s2533_s15, 4  ;;  %s2443_s16 = int_to_ptr.vmem [resolvable:$false] %s2442_s16 }
  0xed   : > { %2088 = vmatpush3.bf16.msk.msra.mxu1 %vm2948_vm9, %v2531_v13  ;;  %vm3003_vm8 = vmpackc.low %vm814_vm5, %vm813_vm4  ;;  %vm682_vm9 = vcmp.eq.s32.totalorder %v2957_v15, %v1774_v10  ;;  %1207 = vperm.xlu0 %2256, %v1197_v33   ;;  %vm819_vm5 = vcmp.eq.s32.totalorder %v3054_v32, %v2925_v9  ;;  %v1095_v61 = vld [vmem:[%s3473_s18 + $0x10] sm:$0xff]  ;;  %v1096_v62 = vld [vmem:[%s3473_s18 + $0x18] sm:$0xff]  ;;  %p3481_p13 = scmp.ne.s32.totalorder %s3478_s17, 0  ;;  %s2444_s27 = scalar_lea.vmem %s2443_s16, 32 }
  0xee   : > { %2090 = vmatprep.subr.msk.bf16.mxu1 %vm2968_vm15, %v2531_v13  ;;  %v689_v29 = vsel %vm682_vm9, 1.0, %v2532_v28  ;;  %vm3042_vm13 = vmpackc.low %vm816_vm11, %vm815_vm10  ;;  %v832_v43 = vsel %vm819_vm5, 1.0, %v2532_v28  ;;  %vm850_vm9 = vcmask 1043456   ;;  %vm948_vm11 = vcmp.eq.s32.totalorder %v2920_v7, %v3037_v30  ;;  %v1570_v0 = vld [vmem:[%s3476_s0] sm:$0xff]  ;;  %v1571_v1 = vld [vmem:[%s3476_s0 + $0x8] sm:$0xff]  ;;  %p2445_p7 = scmp.lt.s32.totalorder %s3321_s6, %s2443_s16  ;;  %p2446_p3 = scmp.lt.s32.totalorder %s2444_s27, %s2438_s13 }
  0xef   : > { %2076 = vmatpush3.bf16.msk.msra.mxu0 %vm2073_vm6, %v2531_v13  ;;  %vm3086_vm6 = vmpackc.low %vm945_vm3, %vm944_vm2  ;;  %1484 = vperm.xlu1 %2257, %v1476_v41   ;;  %vm1069_vm2 = vcmp.eq.s32.totalorder %v2914_v5, %v3103_v40  ;;  %vm1070_vm3 = vcmp.eq.s32.totalorder %v2917_v6, %v3103_v40  ;;  %v1238_v48 = vld [vmem:[#allocation11] sm:$0xff]  ;;  %v1241_v51 = vld [vmem:[#allocation11 + $0x18] sm:$0xff]  ;;  %p2440_p2 = pnand %p2439_p4, %p3481_p13 }
  0xf0   : > { %2078 = vmatprep.subr.msk.bf16.mxu0 %vm2993_vm7, %v2531_v13  ;;  %s3480_s9 = smov %s3479_s23  ;;  %s3319_s19 = scalar_lea.hbm %s3479_s23, %s1845_s12 }
  0xf1   : > { %2092 = vmatpush3.bf16.msk.msra.mxu1 %vm2968_vm15, %v2531_v13  ;;  %vm818_vm15 = vcmp.eq.s32.totalorder %v3017_v25, %v2925_v9  ;;  %1479 = vperm.xlu0 %2256, %v1475_v39   ;;  %p2441_p5 = pneg %p2440_p2  ;;  %p2447_p6 = por %p2446_p3, %p2445_p7 }
  0xf2   : > { %2094 = vmatprep.subr.msk.bf16.mxu1 %vm3003_vm8, %v2531_v13  ;;  %vm3076_vm4 = vmpackc.low %vm818_vm15, %vm817_vm14  ;;  %vm1067_vm14 = vcmp.eq.s32.totalorder %v2908_v2, %v3103_v40  ;;  %vm1068_vm15 = vcmp.eq.s32.totalorder %v2911_v4, %v3103_v40 }
  0xf3   : > { %2080 = vmatpush3.bf16.msk.msra.mxu0 %vm2993_vm7, %v2531_v13  ;;  %vm946_vm7 = vcmp.eq.s32.totalorder %v2914_v5, %v3037_v30  ;;  %vm2117_vm5 = vmpackc.low %vm1068_vm15, %vm1067_vm14  ;;  %1222 = vperm.xlu1 %2257, %v1200_v47   ;;  %vm1074_vm14 = vcmp.eq.s32.totalorder %v2960_v16, %v3103_v40  ;;  %v1245_v47 = vld [vmem:[#allocation12 + $0x18] sm:$0xff]  ;;  %p2448_p10 = pnand %p2447_p6, %p2441_p5 }
  0xf4   : > { %1938 = vmatprep.subr.msk.mxu0 %vm707_vm12, %v689_v29 }
  0xf5   : > { %2096 = vmatpush3.bf16.msk.msra.mxu1 %vm3003_vm8, %v2531_v13  ;;  %vm947_vm8 = vcmp.eq.s32.totalorder %v2917_v6, %v3037_v30  ;;  %1217 = vperm.xlu0 %2256, %v1199_v46   ;;  %v1244_v46 = vld [vmem:[#allocation12 + $0x10] sm:$0xff] }
  0xf6   : > { %2098 = vmatprep.subr.msk.bf16.mxu1 %vm3042_vm13, %v2531_v13  ;;  %vm3119_vm10 = vmpackc.low %vm947_vm8, %vm946_vm7  ;;  %vm1071_vm8 = vcmp.eq.s32.totalorder %v2920_v7, %v3103_v40 }
  0xf7   : > { %1939 = vmatpush3.msk.msra.mxu0 %vm707_vm12, %v689_v29  ;;  %vm3181_vm7 = vmpackc.low %vm1070_vm3, %vm1069_vm2  ;;  %vm1075_vm2 = vcmp.eq.s32.totalorder %v2981_v18, %v3103_v40  ;;  %vm1076_vm3 = vcmp.eq.s32.totalorder %v2984_v19, %v3103_v40  ;;  %1579 = vperm.xlu1 %2257, %v1571_v1  }
  0xf8   : > { %1941 = vmatmul.mubr.msk.f32.vlgmr.msra.gmra.mrb[0].mxu0 %vm694_vm0, %v691_v35  ;;  %2106 = vmatprep.subr.msk.bf16.mxu0 %vm3086_vm6, %v2531_v13 }
  0xf9   : > { %2100 = vmatpush3.bf16.msk.msra.mxu1 %vm3042_vm13, %v2531_v13  ;;  %1943 = vmatprep.mubr.msk.f32.mxu0 %vm694_vm0, %v692_v37  ;;  %vm949_vm13 = vcmp.eq.s32.totalorder %v2923_v8, %v3037_v30 }
  0xfa   : > { %2102 = vmatprep.subr.msk.bf16.mxu1 %vm3076_vm4, %v2531_v13  ;;  %2108 = vmatpush3.bf16.msk.msra.mxu0 %vm3086_vm6, %v2531_v13  ;;  %vm950_vm6 = vcmp.eq.s32.totalorder %v2957_v15, %v3037_v30 }
  0xfb   : > { %2110 = vmatprep.subr.msk.bf16.mxu0 %vm3119_vm10, %v2531_v13  ;;  %v957_v52 = vsel %vm950_vm6, 1.0, %v2532_v28  ;;  %1574 = vperm.xlu0 %2256, %v1570_v0  }
  0xfc   : > { %1944 = vmatmul.mubr.msk.f32.gmra.mrb[2].mxu0 %vm694_vm0, %v693_v42 }
  0xfd   : > { %2104 = vmatpush3.bf16.msk.msra.mxu1 %vm3076_vm4, %v2531_v13  ;;  %vm3161_vm4 = vmpackc.low %vm949_vm13, %vm948_vm11  ;;  %1992 = vmatprep.mubr.msk.f32.mxu0 %vm694_vm0, %v958_v45  ;;  %vm1073_vm13 = vcmp.eq.s32.totalorder %v2957_v15, %v3103_v40  ;;  %v1243_v45 = vld [vmem:[#allocation12 + $0x8] sm:$0xff] }
  0xfe   : > { %1970 = vmatprep.subr.msk.mxu1 %vm850_vm9, %v832_v43  ;;  %2112 = vmatpush3.bf16.msk.msra.mxu0 %vm3119_vm10, %v2531_v13  ;;  %vm1072_vm10 = vcmp.eq.s32.totalorder %v2923_v8, %v3103_v40  ;;  %vm2129_vm15 = vmpackc.low %vm1074_vm14, %vm1073_vm13 }
  0xff   : > { %2114 = vmatprep.subr.msk.bf16.mxu0 %vm3161_vm4, %v2531_v13  ;;  %vm3209_vm11 = vmpackc.low %vm1072_vm10, %vm1071_vm8  ;;  %1595 = vperm.xlu0 %2256, %v1592_v3  }
 0x101   : > { %1971 = vmatpush3.msk.msra.mxu1 %vm850_vm9, %v832_v43 }
 0x102   : > { %1973 = vmatmul.mubr.msk.f32.vlgmr.msra.gmra.mrb[0].mxu1 %vm837_vm1, %v834_v49  ;;  %2118 = vmatprep.subr.msk.bf16.mxu1 %vm2117_vm5, %v2531_v13  ;;  %v1239_v49 = vld [vmem:[#allocation11 + $0x8] sm:$0xff] }
 0x103   : > { %2120 = vmatpush3.bf16.msk.msra.mxu1 %vm2117_vm5, %v2531_v13  ;;  %1975 = vmatprep.mubr.msk.f32.mxu1 %vm837_vm1, %v835_v50  ;;  %vm1078_vm5 = vcmp.eq.s32.totalorder %v3017_v25, %v3103_v40  ;;  %v1240_v50 = vld [vmem:[#allocation11 + $0x10] sm:$0xff] }
 0x104   : > { %2122 = vmatprep.subr.msk.bf16.mxu1 %vm3181_vm7, %v2531_v13  ;;  %2116 = vmatpush3.bf16.msk.msra.mxu0 %vm3161_vm4, %v2531_v13  ;;  %vm1077_vm4 = vcmp.eq.s32.totalorder %v3014_v24, %v3103_v40 }
 0x105   : > { %1990 = vmatprep.subr.msk.mxu0 %vm707_vm12, %v957_v52  ;;  %vm2137_vm6 = vmpackc.low %vm1078_vm5, %vm1077_vm4 }
 0x106   : > { %1976 = vmatmul.mubr.msk.f32.gmra.mrb[2].mxu1 %vm837_vm1, %v836_v53 }
 0x107   : > { %2124 = vmatpush3.bf16.msk.msra.mxu1 %vm3181_vm7, %v2531_v13  ;;  %2024 = vmatprep.mubr.msk.f32.mxu1 %vm837_vm1, %v1093_v54  ;;  %vm1079_vm7 = vcmp.eq.s32.totalorder %v3054_v32, %v3103_v40 }
 0x108   : > { %2126 = vmatprep.subr.msk.bf16.mxu1 %vm3209_vm11, %v2531_v13  ;;  %1991 = vmatpush3.msk.msra.mxu0 %vm707_vm12, %v957_v52  ;;  %vm2133_vm12 = vmpackc.low %vm1076_vm3, %vm1075_vm2  ;;  %v1092_v59 = vsel %vm1079_vm7, 1.0, %v2532_v28  ;;  %v1473_v52 = vld [vmem:[%s3477_s29] sm:$0xff] }
 0x109   : > { %1993 = vmatmul.mubr.msk.f32.vlgmr.msra.gmra.mrb[4].mxu0 %vm694_vm0, %v959_v56 }
 0x10a   : > { %1995 = vmatprep.mubr.msk.f32.mxu0 %vm694_vm0, %v960_v57 }
 0x10b   : > { %2128 = vmatpush3.bf16.msk.msra.mxu1 %vm3209_vm11, %v2531_v13 }
 0x10c   : > { %2130 = vmatprep.subr.msk.bf16.mxu1 %vm2129_vm15, %v2531_v13 }
 0x10d   : > { %1996 = vmatmul.mubr.msk.f32.gmra.mrb[6].mxu0 %vm694_vm0, %v961_v58  ;;  %vm1246_vm0 = vcmask 261120  }
 0x10e   : > { %2038 = vmatprep.mubr.msk.f32.mxu0 %vm1246_vm0, %v1242_v63 }
 0x10f   : > { %2132 = vmatpush3.bf16.msk.msra.mxu1 %vm2129_vm15, %v2531_v13 }
 0x110   : > { %2134 = vmatprep.subr.msk.bf16.mxu1 %vm2133_vm12, %v2531_v13 }
 0x113   : > { %2136 = vmatpush3.bf16.msk.msra.mxu1 %vm2133_vm12, %v2531_v13 }
 0x114   : > { %2138 = vmatprep.subr.msk.bf16.mxu1 %vm2137_vm6, %v2531_v13 }
 0x117   : > { %2140 = vmatpush3.bf16.msk.msra.mxu1 %vm2137_vm6, %v2531_v13 }
 0x118   : > { %2022 = vmatprep.subr.msk.mxu1 %vm850_vm9, %v1092_v59 }
 0x11b   : > { %2023 = vmatpush3.msk.msra.mxu1 %vm850_vm9, %v1092_v59 }
 0x11c   : > { %2025 = vmatmul.mubr.msk.f32.vlgmr.msra.gmra.mrb[4].mxu1 %vm837_vm1, %v1094_v60 }
 0x11d   : > { %2027 = vmatprep.mubr.msk.f32.mxu1 %vm837_vm1, %v1095_v61 }
 0x120   : > { %2028 = vmatmul.mubr.msk.f32.gmra.mrb[6].mxu1 %vm837_vm1, %v1096_v62 }
 0x161   : > { %v3282_v5 = vpop.permute.xlu1 %1457 }
 0x164   : > { %v3280_v4 = vpop.permute.xlu0 %1447 }
 0x165   : > { %v3286_v7 = vpop.permute.xlu1 %1462 }
 0x168   : > { %v3284_v6 = vpop.permute.xlu0 %1452 }
 0x16a   : > { %v1213_v11 = vpop.permute.xlu1 %1212 }
 0x16c   : > { %v1208_v9 = vpop.permute.xlu0 %1207 }
 0x16e   : > { %v3290_v15 = vpop.permute.xlu1 %1484 }
 0x170   : > { %v3288_v14 = vpop.permute.xlu0 %1479 }
 0x172   : > { %v1223_v26 = vpop.permute.xlu1 %1222 }
 0x174   : > { %v1218_v23 = vpop.permute.xlu0 %1217 }
 0x1cb   : > { %v1942_v8 = vpop.f32.mrb[0].mxu0 }
 0x1cc   : > { %v777_v10 = vpop.f32.mrb[1].mxu0 }
 0x1cf   : > { %v1945_v12 = vpop.f32.mrb[2].mxu0 }
 0x1d0   : > { %v787_v13 = vpop.f32.mrb[3].mxu0 }
 0x1d5   : > { %v1974_v16 = vpop.f32.mrb[0].mxu1 }
 0x1d6   : > { %v1202_v17 = vmul.f32 %v1974_v16, %v1942_v8  ;;  %v920_v18 = vpop.f32.mrb[1].mxu1  ;;  %v1575_v16 = vpop.permute.xlu0 %1574 }
 0x1d7   : > { %v1201_v19 = vmul.f32 %v920_v18, %v777_v10 }
 0x1d8   : > { %v1226_v20 = vmul.f32 %v1213_v11, %v1202_v17 }
 0x1d9   : > { %v1225_v21 = vmul.f32 %v1208_v9, %v1201_v19  ;;  %v1977_v22 = vpop.f32.mrb[2].mxu1 }
 0x1da   : > { %v1204_v24 = vmul.f32 %v1977_v22, %v1945_v12  ;;  %v930_v25 = vpop.f32.mrb[3].mxu1  ;;  %v1580_v12 = vpop.permute.xlu1 %1579 }
 0x1db   : > { %v1203_v27 = vmul.f32 %v930_v25, %v787_v13  ;;  %v1229_v28 = vadd.f32 %v1226_v20, %v1225_v21 }
 0x1dc   : > { %v1994_v29 = vpop.f32.mrb[4].mxu0  ;;  %v1228_v31 = vmul.f32 %v1223_v26, %v1204_v24  ;;  %v1600_v26 = vsub.s32 0, %v2908_v2 }
 0x1dd   : > { %v1227_v30 = vmul.f32 %v1218_v23, %v1203_v27  ;;  %v1043_v32 = vpop.f32.mrb[5].mxu0  ;;  %v1596_v27 = vpop.permute.xlu0 %1595 }
 0x1de   : > { %v2149_v33 = vpack.c.bf16 %v1994_v29, %v1043_v32 }
 0x1df   : > { %v1230_v34 = vadd.f32 %v1229_v28, %v1227_v30  ;;  %v1601_v30 = vrot.slane %v1596_v27, %v1600_v26 }
 0x1e0   : > { %v1997_v35 = vpop.f32.mrb[6].mxu0 }
 0x1e1   : > { %v1231_v36 = vadd.f32 %v1230_v34, %v1228_v31  ;;  %v1053_v37 = vpop.f32.mrb[7].mxu0 }
 0x1e2   : > { %v2153_v38 = vpack.c.bf16 %v1997_v35, %v1053_v37 }
 0x1ef   : > { %v2026_v39 = vpop.f32.mrb[4].mxu1 }
 0x1f0   : > { %v1178_v40 = vpop.f32.mrb[5].mxu1 }
 0x1f1   : > { %v2141_v41 = vpack.c.bf16 %v2026_v39, %v1178_v40 }
 0x1f3   : > { %v2029_v42 = vpop.f32.mrb[6].mxu1  ;;  %2142 = vmatprep.subr.bf16.mxu0 %v2141_v41 }
 0x1f4   : > { %v1188_v43 = vpop.f32.mrb[7].mxu1  ;;  %2144 = vmatpush3.bf16.msra.mxu0 %v2141_v41 }
 0x1f5   : > { %v2145_v44 = vpack.c.bf16 %v2029_v42, %v1188_v43 }
 0x1f7   : > { %2146 = vmatprep.subr.bf16.mxu0 %v2145_v44 }
 0x1f8   : > { %2148 = vmatpush3.bf16.msra.mxu0 %v2145_v44 }
 0x1f9   : > { %2150 = vmatprep.subr.bf16.mxu0 %v2149_v33 }
 0x1fb   : > { %2039 = vmatmul.mubr.msk.f32.vlgmr.msra.gmra.mrb[8].mxu0 %vm1246_vm0, %v1243_v45 }
 0x1fc   : > { %2152 = vmatpush3.bf16.msra.mxu0 %v2149_v33  ;;  %2041 = vmatprep.mubr.msk.f32.mxu0 %vm1246_vm0, %v1244_v46 }
 0x1fd   : > { %2154 = vmatprep.subr.bf16.mxu0 %v2153_v38 }
 0x1ff   : > { %2042 = vmatmul.mubr.msk.f32.gmra.mrb[10].mxu0 %vm1246_vm0, %v1245_v47 }
 0x200   : > { %2156 = vmatpush3.bf16.msra.mxu0 %v2153_v38  ;;  %2052 = vmatprep.mubr.msk.f32.mxu0 %vm1246_vm0, %v1238_v48 }
 0x203   : > { %2053 = vmatmul.mubr.msk.f32.vlgmr.msra.gmra.mrb[8].mxu0 %vm1246_vm0, %v1239_v49 }
 0x204   : > { %2055 = vmatprep.mubr.msk.f32.mxu0 %vm1246_vm0, %v1240_v50 }
 0x207   : > { %2056 = vmatmul.mubr.msk.f32.gmra.mrb[10].mxu0 %vm1246_vm0, %v1241_v51 }
 0x208   : > { %2066 = vmatprep.mubr.msk.f32.mxu0 %vm1246_vm0, %v1473_v52 }
 0x2d6   : > { %v2054_v53 = vpop.f32.mrb[8].mxu0 }
 0x2d7   : > { %v1466_v54 = vadd.f32 %v2054_v53, %v3284_v6  ;;  %v1422_v55 = vpop.f32.mrb[9].mxu0  ;;  %v1232_v6 = vrot.slane %v1231_v36, 4 }
 0x2d8   : > { %v1465_v56 = vadd.f32 %v3280_v4, %v1422_v55  ;;  %v1474_v4 = vld [vmem:[%s3477_s29 + $0x8] sm:$0xff] }
 0x2d9   : > { %v1470_v57 = vmax.f32 %v1466_v54, 0.0  ;;  %v1233_v11 = vadd.f32 %v1232_v6, %v1231_v36 }
 0x2da   : > { %v1469_v58 = vmax.f32 %v1465_v56, 0.0  ;;  %v2057_v59 = vpop.f32.mrb[10].mxu0 }
 0x2db   : > { %v1468_v60 = vadd.f32 %v2057_v59, %v3286_v7  ;;  %v1432_v61 = vpop.f32.mrb[11].mxu0  ;;  %v1234_v19 = vrot.slane %v1233_v11, 2 }
 0x2dc   : > { %v2157_v62 = vpack.c.bf16 %v1470_v57, %v1469_v58  ;;  %v1467_v63 = vadd.f32 %v3282_v5, %v1432_v61 }
 0x2dd   : > { %v1472_v0 = vmax.f32 %v1468_v60, 0.0  ;;  %v1235_v22 = vadd.f32 %v1234_v19, %v1233_v11 }
 0x2de   : > { %v1471_v1 = vmax.f32 %v1467_v63, 0.0  ;;  %2158 = vmatprep.subr.bf16.mxu0 %v2157_v62 }
 0x2df   : > { %2160 = vmatpush3.bf16.msra.mxu0 %v2157_v62  ;;  %v1236_v25 = vrot.slane %v1235_v22, 1 }
 0x2e0   : > { %v2161_v3 = vpack.c.bf16 %v1472_v0, %v1471_v1 }
 0x2e1   : > { %v1237_v28 = vadd.f32 %v1236_v25, %v1235_v22 }
 0x2e2   : > { %2162 = vmatprep.subr.bf16.mxu0 %v2161_v3 }
 0x2e3   : > { %2164 = vmatpush3.bf16.msra.mxu0 %v2161_v3 }
 0x2e6   : > { %2067 = vmatmul.mubr.msk.f32.vlgmr.msra.gmra.mrb[12].mxu0 %vm1246_vm0, %v1474_v4 }
 0x3b9   : > { %v2068_v8 = vpop.f32.mrb[12].mxu0 }
 0x3ba   : > { %v1565_v7 = vadd.f32 %v2068_v8, %v3290_v15  ;;  %v1559_v9 = vpop.f32.mrb[13].mxu0 }
 0x3bb   : > { %v1560_v5 = vadd.f32 %v1559_v9, %v3288_v14 }
 0x3bc   : > { %v1569_v10 = vmax.f32 %v1565_v7, 0.0 }
 0x3bd   : > { %v1568_v13 = vmax.f32 %v1560_v5, 0.0 }
 0x3be   : > { %v1583_v17 = vmul.f32 %v1580_v12, %v1569_v10 }
 0x3bf   : > { %v1582_v18 = vmul.f32 %v1575_v16, %v1568_v13 }
 0x3c1   : > { %v1584_v20 = vadd.f32 %v1583_v17, %v1582_v18 }
 0x3c3   : > { %v1585_v21 = vrot.slane %v1584_v20, 4 }
 0x3c5   : > { %v1586_v23 = vadd.f32 %v1585_v21, %v1584_v20 }
 0x3c7   : > { %v1587_v24 = vrot.slane %v1586_v23, 2 }
 0x3c9   : > { %v1588_v15 = vadd.f32 %v1587_v24, %v1586_v23 }
 0x3cb   : > { %v1589_v14 = vrot.slane %v1588_v15, 1 }
 0x3cd   : > { %v1590_v29 = vadd.f32 %v1589_v14, %v1588_v15 }
 0x3cf   : > { %v1591_v31 = vadd.f32 %v1590_v29, %v1237_v28 }
 0x3d1   : > { %v1602_v32 = vadd.f32 %v1601_v30, %v1591_v31 }
 0x3d3   : > { %v1844_v33 = vmul.f32 -1.442695, %v1602_v32 }
 0x3d5   : > { %2258 = vpow2.f32 %v1844_v33 }
 0x3df   : > { %v2259_v34 = vpop.eup %2258 }
 0x3e0   : > { %v1606_v35 = vadd.f32 1.0, %v2259_v34 }
 0x3e2   : > { %2260 = vrcp.f32 %v1606_v35 }
 0x3ec   : > { %v2261_v2 = vpop.eup %2260 }
 0x3ed   : > { %1609 = vst [vmem:[%s662_s30] sm:$0x1] %v2261_v2 }
 0x3ee   : > { %2451 = shalt.err (!%p2448_p10)
}
 0x3ef   : > { %s2452_s25 = scalar_lea.hbm %s3319_s19, 16  ;;  %s2456_s30 = scalar_lea.hbm %s3480_s9, 32 }
 0x3f0   : > { %p2453_p1 = scmp.ne.s32.totalorder %s3319_s19, %s2452_s25  ;;  %p2457_p8 = scmp.lt.u32.totalorder %s3319_s19, %s3480_s9 }
 0x3f1   : > { %p2458_p9 = scmp.lt.u32.totalorder %s2456_s30, %s2452_s25  ;;  %p2460_p4 = scmp.lt.u32.totalorder %s2452_s25, %s3319_s19 }
 0x3f2   : > { %p2454_p0 = pnand %p2453_p1, %p3481_p13 }
 0x3f3   : > { %p2459_p11 = por %p2458_p9, %p2457_p8 }
 0x3f4   : > { %p2455_p12 = pneg %p2454_p0 }
 0x3f5   : > { %p2461_p2 = por %p2460_p4, %p2459_p11 }
 0x3f7   : > { %p2462_p5 = pnand %p2461_p2, %p2455_p12 }
 0x3f9   : > { %2465 = shalt.err (!%p2462_p5)
}
 0x3fa   : > { %2185 = dma.vmem_to_hbm [thread:$0]  (%p3481_p13), %s3321_s6, 16, %s3319_s19, %s1611_s22  }
 0x3fb PF: > { %s3482_s23 = sld [smem:[#allocation21_spill]]  ;;  %s3483_s13 = sld [smem:[#allocation23_spill]] }
 0x3fc   : > { %p3485_p3 = scmp.ge.s32.totalorder %s2520_s26, 2 }
 0x401   : > { %s1635_s15 = sand.u32 1, %s3482_s23   ;;  %p3484_p7 = scmp.ne.s32.totalorder %s3483_s13, 0 }
 0x402   : > { %s1636_s16 = scalar_lea.sflag [#allocation5], %s1635_s15 }
 0x403   : > { %p2208_p6 = pnand %p3485_p3, %p3484_p7 }
 0x405   : > { %2503 = dma.done.wait (!%p2208_p6), %s1636_s16, 16  }
 0x406   : > { %2505 = vsyncadd (!%p2208_p6), %s1636_s16, 4294967280  ;;  %s3486_s26 = sld [smem:[#allocation24_spill]]  ;;  %s3487_s27 = sld [smem:[#allocation22_spill]] }
 0x407   : > { %s3488_s25 = sld [smem:[#allocation25_spill]]  ;;  %s3489_s23 = smov %s2512_s24 }
 0x40c   : > { %p38_p10 = scmp.ge.s32.totalorder %s3486_s26, 4   ;;  %s3490_s24 = smov %s3487_s27 }
 0x40e   :  { %40 = sbr.rel (!%p38_p10) target bundleno = 20 (0x14), region = 174 }
 0x415   :  { %1640 = vsyncpa [#allocation4], 1 }
 0x416   :  { %1642 = vsyncpa [#allocation4 + $0x1], 1 }
 0x417   :  { %1643 = vsyncpa [#allocation7], 1 }
 0x418   :  { %1645 = vsyncpa [#allocation7 + $0x1], 1 }
 0x419   :  { %1646 = vsyncpa [#allocation10], 1 }
 0x41a   :  { %1648 = vsyncpa [#allocation10 + $0x1], 1 }
 0x41b   :  { %1649 = vsyncpa [#allocation13], 1 }
 0x41c   :  { %1650 = vsyncpa [#allocation5], 1 }
 0x41d   :  { %1652 = vsyncpa [#allocation5 + $0x1], 1 }

</bundles_post_ra>
